<compile_context>
chip_gen: v7x
topology: tpu7x:2x2x1
jax: 0.10.0
libtpu: 0.0.40
codegen_flags: <defaults>
</compile_context>

<pallas_src>
import jax
import jax.numpy as jnp
from jax import lax
from jax.experimental import pallas as pl
from jax.experimental.pallas import tpu as pltpu

B, CIN = 2, 8
C1, C2 = 6, 4
K1, K2 = 8, 2
H0 = W0 = 8          # spatial after layer 0
H1 = W1 = 9          # spatial after layer 1
EPS = 1e-5

N0 = C1 * H0 * W0    # 384  : flat (c, h, w) size after layer 0
N1 = C2 * H1 * W1    # 324  : flat (c, h, w) size of the final output


def _fused_forward_kernel(x_ref, w1_ref, b1_ref, g_ref, betaf_ref,
                          seg_ref, segt_ref, w2_ref, b2_ref, o_ref):
    # x: (B, CIN)            w1: (CIN, N0)        b1: (1, N0)
    # g: (1, C1)             betaf: (1, N0)
    # seg: (N0, C1)          segt: (C1, N0)
    # w2: (N0, N1)           b2: (1, N1)          o: (B, N1)

    # ---- layer 0: ConvTranspose2d(8->6, k=8) on a 1x1 input == dense matmul + ReLU.
    # Flat output order is channel-major (c, h, w).
    h0 = jnp.dot(x_ref[...], w1_ref[...], preferred_element_type=jnp.float32) + b1_ref[...]
    h0 = jnp.maximum(h0, 0.0)                                                  # (B, N0)

    # ---- BatchNorm2d(C1), training mode: batch statistics over (N, H, W), biased variance.
    # Per-channel sums / broadcasts via constant segment matrices (pure matmuls; no reshapes).
    inv_n = 1.0 / float(B * H0 * W0)
    mean_c = jnp.sum(jnp.dot(h0, seg_ref[...], preferred_element_type=jnp.float32),
                     axis=0, keepdims=True) * inv_n                            # (1, C1)
    mean_full = jnp.dot(mean_c, segt_ref[...], preferred_element_type=jnp.float32)  # (1, N0)
    diff = h0 - mean_full                                                      # (B, N0)
    var_c = jnp.sum(jnp.dot(diff * diff, seg_ref[...], preferred_element_type=jnp.float32),
                    axis=0, keepdims=True) * inv_n                             # (1, C1)
    scale_c = lax.rsqrt(var_c + EPS) * g_ref[...]                              # (1, C1)
    hn = diff * jnp.dot(scale_c, segt_ref[...],
                        preferred_element_type=jnp.float32) + betaf_ref[...]   # (B, N0)

    # ---- layer 1: ConvTranspose2d(6->4, k=2) + bias + ReLU.
    # All 4 kernel taps and the 8x8 -> 9x9 spatial scatter are folded into one matmul with a
    # precomputed scatter-weight matrix; the result is already flat NCHW (c, h, w) order.
    y = jnp.dot(hn, w2_ref[...], preferred_element_type=jnp.float32) + b2_ref[...]
    o_ref[...] = jnp.maximum(y, 0.0)                                           # one dense store


def prepare_params(w1, b1, gamma, beta, w2, b2):
    """One-time (model-load) parameter preparation; hoisted out of the hot forward path."""
    # layer 0 weight: (in, out, kH, kW) -> (in, out*kH*kW) = (8, 384), flat (c, h, w) order.
    w1p = w1.reshape(CIN, N0).astype(jnp.float32)
    b1f = jnp.repeat(b1.astype(jnp.float32), H0 * W0).reshape(1, N0)

    g_row = gamma.astype(jnp.float32).reshape(1, C1)
    betaf = jnp.repeat(beta.astype(jnp.float32), H0 * W0).reshape(1, N0)

    # Segment matrices: column block c (64 wide) of the flat layout belongs to channel c.
    seg = jnp.repeat(jnp.eye(C1, dtype=jnp.float32), H0 * W0, axis=0)          # (N0, C1)
    segt = seg.T                                                               # (C1, N0)

    # Fold the ConvTranspose2d(6->4, k=2, s=1) taps + spatial scatter into one dense matrix:
    # W2big[(c, ih, iw), (d, oh, ow)] = sum_{kh,kw} w2[c, d, kh, kw] * [oh==ih+kh] * [ow==iw+kw]
    wbig = jnp.zeros((C1, H0, W0, C2, H1, W1), jnp.float32)
    for kh in range(K2):
        ph = jnp.eye(H0, H1, kh, dtype=jnp.float32)                            # (8, 9)
        for kw in range(K2):
            pw = jnp.eye(W0, W1, kw, dtype=jnp.float32)                        # (8, 9)
            wbig = wbig + jnp.einsum('cd,ho,wp->chwdop',
                                     w2[:, :, kh, kw].astype(jnp.float32), ph, pw)
    w2big = wbig.reshape(N0, N1)                                               # (384, 324)
    b2f = jnp.repeat(b2.astype(jnp.float32), H1 * W1).reshape(1, N1)           # (1, 324)

    return (w1p, b1f, g_row, betaf, seg, segt, w2big, b2f)


def linear_to_conv2d_forward(x, w1p, b1f, g_row, betaf, seg, segt, w2big, b2f):
    vmem = pl.BlockSpec(memory_space=pltpu.MemorySpace.VMEM)
    y_flat = pl.pallas_call(
        _fused_forward_kernel,
        out_shape=jax.ShapeDtypeStruct((B, N1), jnp.float32),
        in_specs=[vmem] * 9,
        out_specs=vmem,
    )(x, w1p, b1f, g_row, betaf, seg, segt, w2big, b2f)
    # Flat (c, h, w) -> NCHW; a pure reshape (no transpose).  torch's .squeeze() is a no-op
    # here (B=2, no unit dims).
    return y_flat.reshape(B, C2, H1, W1)


def reference_forward(x, w1, b1, gamma, beta, w2, b2):
    # pure-JAX NCHW reference of the same forward pass
    h = jnp.einsum('bi,iohw->bohw', x, w1, precision=lax.Precision.HIGHEST) + b1[None, :, None, None]
    h = jnp.maximum(h, 0.0)
    mean = jnp.mean(h, axis=(0, 2, 3), keepdims=True)
    var = jnp.mean((h - mean) ** 2, axis=(0, 2, 3), keepdims=True)
    hn = (h - mean) / jnp.sqrt(var + EPS) * gamma[None, :, None, None] + beta[None, :, None, None]
    y = jnp.zeros((B, C2, H1, W1), jnp.float32) + b2[None, :, None, None]
    for kh in range(K2):
        for kw in range(K2):
            tap = jnp.einsum('bchw,cd->bdhw', hn, w2[:, :, kh, kw], precision=lax.Precision.HIGHEST)
            y = y.at[:, :, kh:kh + H0, kw:kw + W0].add(tap)
    return jnp.maximum(y, 0.0)


if __name__ == "__main__":
    key = jax.random.PRNGKey(0)
    kx, k1, k2, k3, k4 = jax.random.split(key, 5)
    x = jax.random.normal(kx, (B, CIN), jnp.float32)
    # ConvTranspose2d weights (in_channels, out_channels, kH, kW) + biases
    w1 = 0.1 * jax.random.normal(k1, (CIN, C1, K1, K1), jnp.float32)
    b1 = 0.1 * jax.random.normal(k2, (C1,), jnp.float32)
    # BatchNorm2d(6) default init: weight=1, bias=0
    gamma = jnp.ones((C1,), jnp.float32)
    beta = jnp.zeros((C1,), jnp.float32)
    w2 = 0.1 * jax.random.normal(k3, (C1, C2, K2, K2), jnp.float32)
    b2 = 0.1 * jax.random.normal(k4, (C2,), jnp.float32)

    # One-time weight prep (hoisted out of the per-call forward path).
    params = prepare_params(w1, b1, gamma, beta, w2, b2)
    params = tuple(jax.block_until_ready(p) for p in params)

    fwd = jax.jit(linear_to_conv2d_forward)
    out = jax.block_until_ready(fwd(x, *params))

    ref = reference_forward(x, w1, b1, gamma, beta, w2, b2)
    assert out.shape == (B, C2, H1, W1), out.shape
    assert jnp.allclose(out, ref, atol=2e-2, rtol=2e-2), float(jnp.max(jnp.abs(out - ref)))
    print("KERNEL_OK")
</pallas_src>

<mosaic_0001>
module attributes {stable_mosaic.version = 11 : i64} {
  func.func @_fused_forward_kernel(%arg0: memref<2x8xf32, #tpu.memory_space<vmem>>, %arg1: memref<8x384xf32, #tpu.memory_space<vmem>>, %arg2: memref<1x384xf32, #tpu.memory_space<vmem>>, %arg3: memref<1x6xf32, #tpu.memory_space<vmem>>, %arg4: memref<1x384xf32, #tpu.memory_space<vmem>>, %arg5: memref<384x6xf32, #tpu.memory_space<vmem>>, %arg6: memref<6x384xf32, #tpu.memory_space<vmem>>, %arg7: memref<384x324xf32, #tpu.memory_space<vmem>>, %arg8: memref<1x324xf32, #tpu.memory_space<vmem>>, %arg9: memref<2x324xf32, #tpu.memory_space<vmem>>) attributes {dimension_semantics = [], scalar_prefetch = 0 : i64, scratch_operands = 0 : i64, tpu.core_type = #tpu.core_type<tc>} {
    %c0 = arith.constant 0 : index
    %c0_0 = arith.constant 0 : index
    %0 = vector.load %arg0[%c0, %c0_0] : memref<2x8xf32, #tpu.memory_space<vmem>>, vector<2x8xf32>
    %c0_1 = arith.constant 0 : index
    %c0_2 = arith.constant 0 : index
    %1 = vector.load %arg1[%c0_1, %c0_2] : memref<8x384xf32, #tpu.memory_space<vmem>>, vector<8x384xf32>
    %cst = arith.constant dense<0.000000e+00> : vector<2x384xf32>
    %2 = tpu.matmul %0, %1, %cst {dimension_numbers = #tpu.dot_dimension_numbers<[1], [0], [0], [1], [0, 0, 1, 1], [], []>} : vector<2x8xf32>, vector<8x384xf32>, vector<2x384xf32> -> vector<2x384xf32>
    %c0_3 = arith.constant 0 : index
    %c0_4 = arith.constant 0 : index
    %3 = vector.load %arg2[%c0_3, %c0_4] : memref<1x384xf32, #tpu.memory_space<vmem>>, vector<1x384xf32>
    %4 = vector.broadcast %3 : vector<1x384xf32> to vector<2x384xf32>
    %5 = arith.addf %2, %4 : vector<2x384xf32>
    %cst_5 = arith.constant 0.000000e+00 : f32
    %6 = vector.broadcast %cst_5 : f32 to vector<2x384xf32>
    %7 = arith.maximumf %5, %6 : vector<2x384xf32>
    %c0_6 = arith.constant 0 : index
    %c0_7 = arith.constant 0 : index
    %8 = vector.load %arg5[%c0_6, %c0_7] : memref<384x6xf32, #tpu.memory_space<vmem>>, vector<384x6xf32>
    %cst_8 = arith.constant dense<0.000000e+00> : vector<2x6xf32>
    %9 = tpu.matmul %7, %8, %cst_8 {dimension_numbers = #tpu.dot_dimension_numbers<[1], [0], [0], [1], [0, 0, 1, 1], [], []>} : vector<2x384xf32>, vector<384x6xf32>, vector<2x6xf32> -> vector<2x6xf32>
    %cst_9 = arith.constant dense<0.000000e+00> : vector<6xf32>
    %10 = vector.multi_reduction <add>, %9, %cst_9 [0] : vector<2x6xf32> to vector<6xf32>
    %11 = vector.shape_cast %10 : vector<6xf32> to vector<1x6xf32>
    %cst_10 = arith.constant 7.812500e-03 : f32
    %12 = vector.broadcast %cst_10 : f32 to vector<1x6xf32>
    %13 = arith.mulf %11, %12 : vector<1x6xf32>
    %c0_11 = arith.constant 0 : index
    %c0_12 = arith.constant 0 : index
    %14 = vector.load %arg6[%c0_11, %c0_12] : memref<6x384xf32, #tpu.memory_space<vmem>>, vector<6x384xf32>
    %cst_13 = arith.constant dense<0.000000e+00> : vector<1x384xf32>
    %15 = tpu.matmul %13, %14, %cst_13 {dimension_numbers = #tpu.dot_dimension_numbers<[1], [0], [0], [1], [0, 0, 1, 1], [], []>} : vector<1x6xf32>, vector<6x384xf32>, vector<1x384xf32> -> vector<1x384xf32>
    %16 = vector.broadcast %15 : vector<1x384xf32> to vector<2x384xf32>
    %17 = arith.subf %7, %16 : vector<2x384xf32>
    %18 = arith.mulf %17, %17 : vector<2x384xf32>
    %c0_14 = arith.constant 0 : index
    %c0_15 = arith.constant 0 : index
    %19 = vector.load %arg5[%c0_14, %c0_15] : memref<384x6xf32, #tpu.memory_space<vmem>>, vector<384x6xf32>
    %cst_16 = arith.constant dense<0.000000e+00> : vector<2x6xf32>
    %20 = tpu.matmul %18, %19, %cst_16 {dimension_numbers = #tpu.dot_dimension_numbers<[1], [0], [0], [1], [0, 0, 1, 1], [], []>} : vector<2x384xf32>, vector<384x6xf32>, vector<2x6xf32> -> vector<2x6xf32>
    %cst_17 = arith.constant dense<0.000000e+00> : vector<6xf32>
    %21 = vector.multi_reduction <add>, %20, %cst_17 [0] : vector<2x6xf32> to vector<6xf32>
    %22 = vector.shape_cast %21 : vector<6xf32> to vector<1x6xf32>
    %cst_18 = arith.constant 7.812500e-03 : f32
    %23 = vector.broadcast %cst_18 : f32 to vector<1x6xf32>
    %24 = arith.mulf %22, %23 : vector<1x6xf32>
    %cst_19 = arith.constant 9.99999974E-6 : f32
    %25 = vector.broadcast %cst_19 : f32 to vector<1x6xf32>
    %26 = arith.addf %24, %25 : vector<1x6xf32>
    %27 = math.rsqrt %26 : vector<1x6xf32>
    %c0_20 = arith.constant 0 : index
    %c0_21 = arith.constant 0 : index
    %28 = vector.load %arg3[%c0_20, %c0_21] : memref<1x6xf32, #tpu.memory_space<vmem>>, vector<1x6xf32>
    %29 = arith.mulf %27, %28 : vector<1x6xf32>
    %c0_22 = arith.constant 0 : index
    %c0_23 = arith.constant 0 : index
    %30 = vector.load %arg6[%c0_22, %c0_23] : memref<6x384xf32, #tpu.memory_space<vmem>>, vector<6x384xf32>
    %cst_24 = arith.constant dense<0.000000e+00> : vector<1x384xf32>
    %31 = tpu.matmul %29, %30, %cst_24 {dimension_numbers = #tpu.dot_dimension_numbers<[1], [0], [0], [1], [0, 0, 1, 1], [], []>} : vector<1x6xf32>, vector<6x384xf32>, vector<1x384xf32> -> vector<1x384xf32>
    %32 = vector.broadcast %31 : vector<1x384xf32> to vector<2x384xf32>
    %33 = arith.mulf %17, %32 : vector<2x384xf32>
    %c0_25 = arith.constant 0 : index
    %c0_26 = arith.constant 0 : index
    %34 = vector.load %arg4[%c0_25, %c0_26] : memref<1x384xf32, #tpu.memory_space<vmem>>, vector<1x384xf32>
    %35 = vector.broadcast %34 : vector<1x384xf32> to vector<2x384xf32>
    %36 = arith.addf %33, %35 : vector<2x384xf32>
    %c0_27 = arith.constant 0 : index
    %c0_28 = arith.constant 0 : index
    %37 = vector.load %arg7[%c0_27, %c0_28] : memref<384x324xf32, #tpu.memory_space<vmem>>, vector<384x324xf32>
    %cst_29 = arith.constant dense<0.000000e+00> : vector<2x324xf32>
    %38 = tpu.matmul %36, %37, %cst_29 {dimension_numbers = #tpu.dot_dimension_numbers<[1], [0], [0], [1], [0, 0, 1, 1], [], []>} : vector<2x384xf32>, vector<384x324xf32>, vector<2x324xf32> -> vector<2x324xf32>
    %c0_30 = arith.constant 0 : index
    %c0_31 = arith.constant 0 : index
    %39 = vector.load %arg8[%c0_30, %c0_31] : memref<1x324xf32, #tpu.memory_space<vmem>>, vector<1x324xf32>
    %40 = vector.broadcast %39 : vector<1x324xf32> to vector<2x324xf32>
    %41 = arith.addf %38, %40 : vector<2x324xf32>
    %cst_32 = arith.constant 0.000000e+00 : f32
    %42 = vector.broadcast %cst_32 : f32 to vector<2x324xf32>
    %43 = arith.maximumf %41, %42 : vector<2x324xf32>
    %c0_33 = arith.constant 0 : index
    %c0_34 = arith.constant 0 : index
    %44 = vector.load %arg9[%c0_33, %c0_34] : memref<2x324xf32, #tpu.memory_space<vmem>>, vector<2x324xf32>
    tpu.vector_store %arg9[%c0_33, %c0_34], %43 {strides = array<i32>} : memref<2x324xf32, #tpu.memory_space<vmem>>, vector<2x324xf32>,
    return
  }
}

</mosaic_0001>

<bundles_post_ra>
// kernel: linear_to_conv2d_forward.1
= control target key start
LH: loop header
LB: loop body
LE: loop exit
PB: predicated region body
PF: predicated region fallthrough
CT: control target
= control target key end

     0   :  { %v1949_v2 = vmov 0.0   ;;  %vm53_vm0 = vcmask 64512   ;;  %vm1950_vm1 = vmmov 0   ;;  %v1951_v20 = vmov 0.0|0.0   ;;  %s2831_s1 = inlined_call_operand.vmem [shape: f32[8,384], index: 1, kind: input, shape index: {}]   ;;  %s2832_s0 = inlined_call_operand.vmem [shape: f32[2,8], index: 0, kind: input, shape index: {}]   ;;  %s2833_s5 = inlined_call_operand.vmem [shape: f32[384,6], index: 5, kind: input, shape index: {}]   ;;  %s2834_s2 = inlined_call_operand.vmem [shape: f32[1,384], index: 2, kind: input, shape index: {}]   ;;  %s2835_s6 = inlined_call_operand.vmem [shape: f32[6,384], index: 6, kind: input, shape index: {}]   ;;  %s2836_s7 = inlined_call_operand.vmem [shape: f32[384,324], index: 7, kind: input, shape index: {}]   ;;  %s2837_s3 = inlined_call_operand.vmem [shape: f32[1,6], index: 3, kind: input, shape index: {}]   ;;  %s2838_s4 = inlined_call_operand.vmem [shape: f32[1,384], index: 4, kind: input, shape index: {}]   ;;  %s2839_s8 = inlined_call_operand.vmem [shape: f32[1,324], index: 8, kind: input, shape index: {}]   ;;  %s2840_s9 = inlined_call_operand.vmem [shape: f32[2,324], index: 9, kind: output, shape index: {}]  }
   0x1   :  { %v34_v0 = vld [vmem:[%s2831_s1 + $0x8] sm:$0xff]  ;;  %v33_v1 = vld [vmem:[%s2831_s1] sm:$0xff]  ;;  %121 = vmatprep.mubr.f32.mxu1 %v1949_v2  ;;  %v35_v4 = vld [vmem:[%s2831_s1 + $0x10] sm:$0xff]  ;;  %vm405_vm2 = vcmask 1045504   ;;  %vm389_vm3 = vcmask 41984   ;;  %vm401_vm4 = vcmask 48128  }
   0x2   :  { %v32_v3 = vld [vmem:[%s2832_s0] sm:$0x3]  ;;  %57 = vmatprep.subr.mxu1 %v34_v0  ;;  %v218_v6 = vld [vmem:[%s2833_s5 + $0x88] sm:$0xff]  ;;  %v219_v13 = vld [vmem:[%s2833_s5 + $0x90] sm:$0xff]  ;;  %vm1371_vm5 = vcmask 1041408   ;;  %vm1372_vm6 = vcmask 1043458  }
   0x3   :  { %v217_v5 = vld [vmem:[%s2833_s5 + $0x80] sm:$0xff]  ;;  %58 = vmatpush1.msra.mxu1 %v33_v1  ;;  %v202_v9 = vld [vmem:[%s2833_s5 + $0x8] sm:$0xff]  ;;  %v220_v14 = vld [vmem:[%s2833_s5 + $0x98] sm:$0xff]  ;;  %vm1374_vm8 = vcmask 553988  }
   0x4   :  { %v2022_v7 = vpack.c.bf16 %v218_v6, %v217_v5  ;;  %v201_v8 = vld [vmem:[%s2833_s5] sm:$0xff]  ;;  %1381 = vmatmul.mubr.msk.f32.vlgmr.msra.gmra.mrb[0].mxu1 %vm53_vm0, %v32_v3  ;;  %1555 = vmatprep.subr.mxu1 %v1949_v2  ;;  %v234_v12 = vld [vmem:[%s2833_s5 + $0x108] sm:$0xff]  ;;  %v2050_v16 = vpack.c.bf16 %v220_v14, %v219_v13  ;;  %v203_v17 = vld [vmem:[%s2833_s5 + $0x10] sm:$0xff] }
   0x5   :  { %v233_v10 = vld [vmem:[%s2833_s5 + $0x100] sm:$0xff]  ;;  %v2035_v11 = vpack.c.bf16 %v202_v9, %v201_v8  ;;  %1556 = vmatpush3.msra.mxu1 %v35_v4  ;;  %1557 = vmatprep.mubr.msk.f32.mxu1 %vm1950_vm1, %v1949_v2  ;;  %v204_v18 = vld [vmem:[%s2833_s5 + $0x18] sm:$0xff]  ;;  %v235_v19 = vld [vmem:[%s2833_s5 + $0x110] sm:$0xff] }
   0x6   :  { %v2048_v15 = vpack.c.bf16 %v234_v12, %v233_v10  ;;  %1676 = vmatprep.subr.bf16.mxu0 %v2022_v7  ;;  %1707 = vmatprep.subr.bf16.mxu1 %v1951_v20  ;;  %v236_v21 = vld [vmem:[%s2833_s5 + $0x118] sm:$0xff]  ;;  %v221_v22 = vld [vmem:[%s2833_s5 + $0xa0] sm:$0xff]  ;;  %v222_v23 = vld [vmem:[%s2833_s5 + $0xa8] sm:$0xff]  ;;  %v2073_v24 = vpack.c.bf16 %v204_v18, %v203_v17 }
   0x7   :  { %1678 = vmatpush3.bf16.msra.mxu0 %v2035_v11  ;;  %v2077_v25 = vpack.c.bf16 %v222_v23, %v221_v22  ;;  %v205_v26 = vld [vmem:[%s2833_s5 + $0x20] sm:$0xff]  ;;  %v206_v27 = vld [vmem:[%s2833_s5 + $0x28] sm:$0xff]  ;;  %v2086_v28 = vpack.c.bf16 %v236_v21, %v235_v19  ;;  %v223_v29 = vld [vmem:[%s2833_s5 + $0xb0] sm:$0xff]  ;;  %v38_v19 = vlaneseq }
   0x8   :  { %1558 = vmatmul.mubr.msk.f32.vlgmr.msra.gmra.mrb[2].mxu1 %vm53_vm0, %v32_v3  ;;  %1680 = vmatprep.subr.bf16.mxu0 %v2050_v16  ;;  %v224_v30 = vld [vmem:[%s2833_s5 + $0xb8] sm:$0xff]  ;;  %v237_v31 = vld [vmem:[%s2833_s5 + $0x120] sm:$0xff]  ;;  %v238_v32 = vld [vmem:[%s2833_s5 + $0x128] sm:$0xff]  ;;  %v2104_v33 = vpack.c.bf16 %v206_v27, %v205_v26 }
   0x9   :  { %1709 = vmatpush3.bf16.msra.mxu1 %v2048_v15  ;;  %1592 = vmatprep.mubr.msk.f32.mxu1 %vm1950_vm1, %v1949_v2  ;;  %v2107_v34 = vpack.c.bf16 %v224_v30, %v223_v29  ;;  %v207_v35 = vld [vmem:[%s2833_s5 + $0x30] sm:$0xff]  ;;  %v208_v36 = vld [vmem:[%s2833_s5 + $0x38] sm:$0xff]  ;;  %v2116_v37 = vpack.c.bf16 %v238_v32, %v237_v31  ;;  %v225_v38 = vld [vmem:[%s2833_s5 + $0xc0] sm:$0xff]  ;;  %v2239_v21 = vshrl.u32 %v38_v19, 7 }
   0xa   :  { %1710 = vmatprep.subr.bf16.mxu1 %v1951_v20  ;;  %v226_v39 = vld [vmem:[%s2833_s5 + $0xc8] sm:$0xff]  ;;  %v239_v40 = vld [vmem:[%s2833_s5 + $0x130] sm:$0xff]  ;;  %v240_v41 = vld [vmem:[%s2833_s5 + $0x138] sm:$0xff]  ;;  %v2132_v42 = vpack.c.bf16 %v208_v36, %v207_v35 }
   0xb   :  { %1682 = vmatpush3.bf16.msra.mxu0 %v2073_v24  ;;  %v2135_v43 = vpack.c.bf16 %v226_v39, %v225_v38  ;;  %v209_v44 = vld [vmem:[%s2833_s5 + $0x40] sm:$0xff]  ;;  %v210_v45 = vld [vmem:[%s2833_s5 + $0x48] sm:$0xff]  ;;  %v2144_v46 = vpack.c.bf16 %v240_v41, %v239_v40  ;;  %v227_v47 = vld [vmem:[%s2833_s5 + $0xd0] sm:$0xff]  ;;  %v2242_v22 = vsub.s32 0, %v2239_v21  ;;  %v2248_v26 = vsub.s32 1, %v2239_v21 }
   0xc   :  { %1684 = vmatprep.subr.bf16.mxu0 %v2077_v25  ;;  %v228_v48 = vld [vmem:[%s2833_s5 + $0xd8] sm:$0xff]  ;;  %v241_v49 = vld [vmem:[%s2833_s5 + $0x140] sm:$0xff]  ;;  %v242_v50 = vld [vmem:[%s2833_s5 + $0x148] sm:$0xff]  ;;  %v2160_v51 = vpack.c.bf16 %v210_v45, %v209_v44  ;;  %v2252_v29 = vsub.s32 2, %v2239_v21 }
   0xd   :  { %1712 = vmatpush3.bf16.msra.mxu1 %v2086_v28  ;;  %v2163_v52 = vpack.c.bf16 %v228_v48, %v227_v47  ;;  %v211_v53 = vld [vmem:[%s2833_s5 + $0x50] sm:$0xff]  ;;  %v212_v54 = vld [vmem:[%s2833_s5 + $0x58] sm:$0xff]  ;;  %v2172_v55 = vpack.c.bf16 %v242_v50, %v241_v49  ;;  %v229_v56 = vld [vmem:[%s2833_s5 + $0xe0] sm:$0xff] }
   0xe   :  { %1713 = vmatprep.subr.bf16.mxu1 %v1951_v20  ;;  %v230_v57 = vld [vmem:[%s2833_s5 + $0xe8] sm:$0xff]  ;;  %v243_v58 = vld [vmem:[%s2833_s5 + $0x150] sm:$0xff]  ;;  %v244_v59 = vld [vmem:[%s2833_s5 + $0x158] sm:$0xff]  ;;  %v2188_v60 = vpack.c.bf16 %v212_v54, %v211_v53 }
   0xf   :  { %1686 = vmatpush3.bf16.msra.mxu0 %v2104_v33  ;;  %v2191_v61 = vpack.c.bf16 %v230_v57, %v229_v56  ;;  %v2194_v62 = vpack.c.bf16 %v244_v59, %v243_v58  ;;  %v213_v63 = vld [vmem:[%s2833_s5 + $0x60] sm:$0xff]  ;;  %v214_v0 = vld [vmem:[%s2833_s5 + $0x68] sm:$0xff]  ;;  %v231_v6 = vld [vmem:[%s2833_s5 + $0xf0] sm:$0xff] }
  0x10   :  { %1688 = vmatprep.subr.bf16.mxu0 %v2107_v34  ;;  %v1701_v1 = vpack.c.bf16 %v214_v0, %v213_v63  ;;  %v245_v3 = vld [vmem:[%s2833_s5 + $0x160] sm:$0xff]  ;;  %v246_v4 = vld [vmem:[%s2833_s5 + $0x168] sm:$0xff]  ;;  %v232_v8 = vld [vmem:[%s2833_s5 + $0xf8] sm:$0xff] }
  0x11   :  { %1715 = vmatpush3.bf16.msra.mxu1 %v2116_v37  ;;  %v2213_v5 = vpack.c.bf16 %v246_v4, %v245_v3  ;;  %v1703_v9 = vpack.c.bf16 %v232_v8, %v231_v6  ;;  %v215_v10 = vld [vmem:[%s2833_s5 + $0x70] sm:$0xff]  ;;  %v216_v12 = vld [vmem:[%s2833_s5 + $0x78] sm:$0xff]  ;;  %v36_v23 = vld [vmem:[%s2834_s2] sm:$0x7] }
  0x12   :  { %1716 = vmatprep.subr.bf16.mxu1 %v1951_v20  ;;  %v1705_v13 = vpack.c.bf16 %v216_v12, %v215_v10  ;;  %v247_v14 = vld [vmem:[%s2833_s5 + $0x170] sm:$0xff]  ;;  %v248_v17 = vld [vmem:[%s2833_s5 + $0x178] sm:$0xff]  ;;  %v41_v27 = vrot.slane %v36_v23, %v2242_v22  ;;  %v49_v35 = vrot.slane %v36_v23, %v2252_v29  ;;  %v909_v3 = vld [vmem:[%s2836_s7 + $0x20] sm:$0xff] }
  0x13   :  { %1690 = vmatpush3.bf16.msra.mxu0 %v2132_v42  ;;  %v2235_v18 = vpack.c.bf16 %v248_v17, %v247_v14  ;;  %v2297_v56 = vld [vmem:[%s2835_s6 + $0x10] sm:$0x3f]  ;;  %v905_v4 = vld [vmem:[%s2836_s7] sm:$0xff]  ;;  %v908_v6 = vld [vmem:[%s2836_s7 + $0x18] sm:$0xff] }
  0x14   :  { %1692 = vmatprep.subr.bf16.mxu0 %v2135_v43  ;;  %v912_v8 = vld [vmem:[%s2836_s7 + $0x38] sm:$0xff]  ;;  %v1789_v10 = vpack.c.bf16 %v908_v6, %v905_v4  ;;  %v914_v14 = vld [vmem:[%s2836_s7 + $0x48] sm:$0xff]  ;;  %vm1373_vm7 = vmor %vm1372_vm6, %vm1371_vm5 }
  0x15   :  { %1718 = vmatpush3.bf16.msra.mxu1 %v2144_v46  ;;  %v918_v17 = vld [vmem:[%s2836_s7 + $0x68] sm:$0xff]  ;;  %vm1375_vm9 = vmor %vm1374_vm8, %vm1373_vm7 }
  0x16   :  { %1719 = vmatprep.subr.bf16.mxu1 %v1951_v20  ;;  %v962_v6 = vld [vmem:[%s2836_s7 + $0x1c8] sm:$0xff] }
  0x17   :  { %1694 = vmatpush3.bf16.msra.mxu0 %v2160_v51 }
  0x18   :  { %1696 = vmatprep.subr.bf16.mxu0 %v2163_v52 }
  0x19   :  { %1721 = vmatpush3.bf16.msra.mxu1 %v2172_v55 }
  0x1a   :  { %1722 = vmatprep.subr.bf16.mxu1 %v1951_v20 }
  0x1b   :  { %1698 = vmatpush3.bf16.msra.mxu0 %v2188_v60 }
  0x1c   :  { %1700 = vmatprep.subr.bf16.mxu0 %v2191_v61 }
  0x1d   :  { %1724 = vmatpush3.bf16.msra.mxu1 %v2194_v62 }
  0x1e   :  { %1725 = vmatprep.subr.bf16.mxu1 %v1951_v20 }
  0x1f   :  { %1702 = vmatpush3.bf16.msra.mxu0 %v1701_v1 }
  0x20   :  { %1704 = vmatprep.subr.bf16.mxu0 %v1703_v9 }
  0x21   :  { %1727 = vmatpush3.bf16.msra.mxu1 %v2213_v5 }
  0x22   :  { %1728 = vmatprep.subr.bf16.mxu1 %v1951_v20 }
  0x23   :  { %1706 = vmatpush3.bf16.msra.mxu0 %v1705_v13 }
  0x24   :  { %1732 = vmatprep.subr.bf16.mxu0 %v2022_v7  ;;  %v45_v7 = vrot.slane %v36_v23, %v2248_v26 }
  0x25   :  { %1730 = vmatpush3.bf16.msra.mxu1 %v2235_v18 }
  0xd7   :  { %v123_v30 = vpop.f32.mrb[0].mxu1 }
  0xd8   :  { %v2255_v31 = vadd.f32 %v123_v30, %v41_v27  ;;  %v125_v32 = vpop.f32.mrb[1].mxu1  ;;  %v917_v27 = vld [vmem:[%s2836_s7 + $0x60] sm:$0xff]  ;;  %v924_v30 = vld [vmem:[%s2836_s7 + $0x98] sm:$0xff] }
  0xd9   :  { %v2258_v36 = vadd.f32 %v125_v32, %v45_v7  ;;  %v920_v7 = vld [vmem:[%s2836_s7 + $0x78] sm:$0xff] }
  0xda   :  { %v198_v40 = vmax.f32 %v2255_v31, 0.0  ;;  %v927_v31 = vld [vmem:[%s2836_s7 + $0xb0] sm:$0xff]  ;;  %v1797_v32 = vpack.c.bf16 %v920_v7, %v917_v27  ;;  %v974_v7 = vld [vmem:[%s2836_s7 + $0x228] sm:$0xff] }
  0xdb   :  { %v199_v38 = vmax.f32 %v2258_v36, 0.0  ;;  %v194_v39 = vpop.f32.mrb[2].mxu1  ;;  %v923_v36 = vld [vmem:[%s2836_s7 + $0x90] sm:$0xff] }
  0xdc   :  { %v2262_v41 = vadd.f32 %v194_v39, %v49_v35  ;;  %v1559_v44 = vpop.f32.mrb[3].mxu1  ;;  %v1799_v35 = vpack.c.bf16 %v927_v31, %v924_v30  ;;  %v930_v39 = vld [vmem:[%s2836_s7 + $0xc8] sm:$0xff]  ;;  %v971_v27 = vld [vmem:[%s2836_s7 + $0x210] sm:$0xff]  ;;  %v981_v31 = vld [vmem:[%s2836_s7 + $0x260] sm:$0xff] }
  0xdd   :  { %313 = vmatprep.mubr.f32.mxu0 %v199_v38  ;;  %v978_v30 = vld [vmem:[%s2836_s7 + $0x248] sm:$0xff] }
  0xde   :  { %v200_v45 = vmax.f32 %v2262_v41, 0.0  ;;  %314 = vmatmul.mubr.f32.vlgmr.msra.gmra.mrb[0].mxu0 %v198_v40 }
  0xdf   :  { %1734 = vmatpush3.bf16.msra.mxu0 %v2035_v11  ;;  %v399_v11 = vld [vmem:[%s2835_s6 + $0x8] sm:$0x3f] }
  0xe0   :  { %1593 = vmatmul.mubr.f32.vlgmr.msra.gmra.mrb[4].mxu1 %v200_v45  ;;  %1736 = vmatprep.subr.bf16.mxu0 %v2050_v16  ;;  %v398_v16 = vld [vmem:[%s2835_s6] sm:$0x3f] }
  0xe1   :  { %479 = vmatprep.mubr.f32.mxu1 %v1949_v2  ;;  %1383 = vmatprep.subr.msk.mxu1 %vm405_vm2, %v399_v11 }
  0xe2   :  { %1384 = vmatpush1.msk.msra.mxu1 %vm405_vm2, %v398_v16 }
  0xe3   :  { %1738 = vmatpush3.bf16.msra.mxu0 %v2073_v24  ;;  %1595 = vmatprep.subr.mxu1 %v1949_v2 }
  0xe4   :  { %1740 = vmatprep.subr.bf16.mxu0 %v2077_v25 }
  0xe7   :  { %1742 = vmatpush3.bf16.msra.mxu0 %v2104_v33 }
  0xe8   :  { %1744 = vmatprep.subr.bf16.mxu0 %v2107_v34 }
  0xeb   :  { %1746 = vmatpush3.bf16.msra.mxu0 %v2132_v42 }
  0xec   :  { %1748 = vmatprep.subr.bf16.mxu0 %v2135_v43 }
  0xef   :  { %1750 = vmatpush3.bf16.msra.mxu0 %v2160_v51 }
  0xf0   :  { %1752 = vmatprep.subr.bf16.mxu0 %v2163_v52 }
  0xf3   :  { %1754 = vmatpush3.bf16.msra.mxu0 %v2188_v60 }
  0xf4   :  { %1756 = vmatprep.subr.bf16.mxu0 %v2191_v61 }
  0xf7   :  { %1758 = vmatpush3.bf16.msra.mxu0 %v1701_v1  ;;  %v906_v1 = vld [vmem:[%s2836_s7 + $0x8] sm:$0xff] }
  0xf8   :  { %1760 = vmatprep.subr.bf16.mxu0 %v1703_v9  ;;  %v915_v9 = vld [vmem:[%s2836_s7 + $0x50] sm:$0xff] }
  0xf9   :  { %v1791_v12 = vpack.c.bf16 %v915_v9, %v912_v8  ;;  %v966_v8 = vld [vmem:[%s2836_s7 + $0x1e8] sm:$0xff]  ;;  %v969_v9 = vld [vmem:[%s2836_s7 + $0x200] sm:$0xff] }
  0xfb   :  { %1762 = vmatpush3.bf16.msra.mxu0 %v1705_v13  ;;  %v911_v13 = vld [vmem:[%s2836_s7 + $0x30] sm:$0xff] }
  0xfc   :  { %v1793_v19 = vpack.c.bf16 %v914_v14, %v911_v13  ;;  %v965_v13 = vld [vmem:[%s2836_s7 + $0x1e0] sm:$0xff]  ;;  %v968_v14 = vld [vmem:[%s2836_s7 + $0x1f8] sm:$0xff] }
 0x1b1   :  { %v1427_v24 = vpop.f32.mrb[0].mxu0 }
 0x1b2   :  { %v1428_v25 = vpop.f32.mrb[1].mxu0 }
 0x1b3   :  { %v1429_v33 = vadd.f32 %v1428_v25, %v1427_v24  ;;  %v385_v34 = vpop.f32.mrb[4].mxu1  ;;  %v939_v24 = vld [vmem:[%s2836_s7 + $0x110] sm:$0xff] }
 0x1b4   :  { %v1594_v42 = vpop.f32.mrb[5].mxu1 }
 0x1b5   :  { %v386_v43 = vadd.f32 %v1429_v33, %v385_v34  ;;  %v935_v34 = vld [vmem:[%s2836_s7 + $0xf0] sm:$0xff]  ;;  %v938_v42 = vld [vmem:[%s2836_s7 + $0x108] sm:$0xff] }
 0x1b7   :  { %v390_v47 = vsel %vm389_vm3, %v386_v43, 0.0  ;;  %v942_v43 = vld [vmem:[%s2836_s7 + $0x128] sm:$0xff] }
 0x1b8   :  { %v391_v48 = vrot.slane %v390_v47, 4 }
 0x1ba   :  { %v392_v49 = vadd.f32 %v391_v48, %v390_v47  ;;  %v945_v47 = vld [vmem:[%s2836_s7 + $0x140] sm:$0xff]  ;;  %v1809_v48 = vpack.c.bf16 %v938_v42, %v935_v34 }
 0x1bc   :  { %v393_v50 = vrot.slane %v392_v49, 2 }
 0x1be   :  { %v394_v51 = vadd.f32 %v393_v50, %v392_v49  ;;  %v1811_v49 = vpack.c.bf16 %v945_v47, %v942_v43  ;;  %v941_v50 = vld [vmem:[%s2836_s7 + $0x120] sm:$0xff] }
 0x1c0   :  { %v395_v52 = vrot.slane %v394_v51, 1 }
 0x1c2   :  { %v396_v53 = vadd.f32 %v395_v52, %v394_v51  ;;  %v944_v51 = vld [vmem:[%s2836_s7 + $0x138] sm:$0xff] }
 0x1c3   :  { %v948_v52 = vld [vmem:[%s2836_s7 + $0x158] sm:$0xff] }
 0x1c4   :  { %v397_v54 = vmul.f32 0.0078125, %v396_v53  ;;  %v951_v53 = vld [vmem:[%s2836_s7 + $0x170] sm:$0xff] }
 0x1c6   :  { %1385 = vmatmul.mubr.msk.f32.vlgmr.msra.gmra.mrb[6].mxu1 %vm401_vm4, %v397_v54 }
 0x1c7   :  { %1596 = vmatpush3.msk.msra.mxu1 %vm405_vm2, %v2297_v56  ;;  %1597 = vmatprep.mubr.msk.f32.mxu1 %vm1950_vm1, %v1949_v2 }
 0x1c8   :  { %1763 = vmatprep.subr.bf16.mxu1 %v1951_v20 }
 0x1ca   :  { %1598 = vmatmul.mubr.msk.f32.vlgmr.msra.gmra.mrb[8].mxu1 %vm401_vm4, %v397_v54  ;;  %v1813_v54 = vpack.c.bf16 %v944_v51, %v941_v50 }
 0x1cb   :  { %1765 = vmatpush3.bf16.msra.mxu1 %v2048_v15  ;;  %1632 = vmatprep.mubr.msk.f32.mxu1 %vm1950_vm1, %v1949_v2 }
 0x1cc   :  { %1766 = vmatprep.subr.bf16.mxu1 %v1951_v20 }
 0x1cf   :  { %1768 = vmatpush3.bf16.msra.mxu1 %v2086_v28 }
 0x1d0   :  { %1769 = vmatprep.subr.bf16.mxu1 %v1951_v20 }
 0x1d3   :  { %1771 = vmatpush3.bf16.msra.mxu1 %v2116_v37 }
 0x1d4   :  { %1772 = vmatprep.subr.bf16.mxu1 %v1951_v20 }
 0x1d7   :  { %1774 = vmatpush3.bf16.msra.mxu1 %v2144_v46 }
 0x1d8   :  { %1775 = vmatprep.subr.bf16.mxu1 %v1951_v20 }
 0x1db   :  { %1777 = vmatpush3.bf16.msra.mxu1 %v2172_v55 }
 0x1dc   :  { %1778 = vmatprep.subr.bf16.mxu1 %v1951_v20 }
 0x1df   :  { %1780 = vmatpush3.bf16.msra.mxu1 %v2194_v62 }
 0x1e0   :  { %1781 = vmatprep.subr.bf16.mxu1 %v1951_v20 }
 0x1e3   :  { %1783 = vmatpush3.bf16.msra.mxu1 %v2213_v5  ;;  %v1787_v5 = vpack.c.bf16 %v909_v3, %v906_v1  ;;  %v963_v1 = vld [vmem:[%s2836_s7 + $0x1d0] sm:$0xff] }
 0x1e4   :  { %1784 = vmatprep.subr.bf16.mxu1 %v1951_v20 }
 0x1e5   :  { %1788 = vmatprep.subr.bf16.mxu0 %v1787_v5  ;;  %v959_v5 = vld [vmem:[%s2836_s7 + $0x1b0] sm:$0xff] }
 0x1e7   :  { %1786 = vmatpush3.bf16.msra.mxu1 %v2235_v18  ;;  %v921_v18 = vld [vmem:[%s2836_s7 + $0x80] sm:$0xff] }
 0x1e8   :  { %1388 = vmatprep.subr.msk.mxu1 %vm405_vm2, %v399_v11  ;;  %v1795_v23 = vpack.c.bf16 %v921_v18, %v918_v17  ;;  %v932_v11 = vld [vmem:[%s2836_s7 + $0xd8] sm:$0xff]  ;;  %v975_v18 = vld [vmem:[%s2836_s7 + $0x230] sm:$0xff] }
 0x1e9   :  { %v972_v17 = vld [vmem:[%s2836_s7 + $0x218] sm:$0xff] }
 0x299   :  { %v481_v15 = vpop.f32.mrb[6].mxu1 }
 0x29a   :  { %v559_v28 = vrot.slane %v481_v15, %v2242_v22  ;;  %v483_v37 = vpop.f32.mrb[7].mxu1  ;;  %v1815_v15 = vpack.c.bf16 %v951_v53, %v948_v52 }
 0x29b   :  { %v563_v46 = vrot.slane %v483_v37, %v2242_v22  ;;  %v950_v37 = vld [vmem:[%s2836_s7 + $0x168] sm:$0xff] }
 0x29c   :  { %v2328_v55 = vsub.f32 %v198_v40, %v559_v28  ;;  %v933_v40 = vld [vmem:[%s2836_s7 + $0xe0] sm:$0xff]  ;;  %v947_v28 = vld [vmem:[%s2836_s7 + $0x150] sm:$0xff] }
 0x29d   :  { %v2332_v57 = vsub.f32 %v199_v38, %v563_v46  ;;  %v552_v58 = vpop.f32.mrb[8].mxu1  ;;  %v926_v38 = vld [vmem:[%s2836_s7 + $0xa8] sm:$0xff]  ;;  %v1803_v44 = vpack.c.bf16 %v933_v40, %v930_v39  ;;  %v984_v39 = vld [vmem:[%s2836_s7 + $0x278] sm:$0xff]  ;;  %v987_v40 = vld [vmem:[%s2836_s7 + $0x290] sm:$0xff] }
 0x29e   :  { %v567_v59 = vrot.slane %v552_v58, %v2242_v22  ;;  %v1599_v60 = vpop.f32.mrb[9].mxu1  ;;  %v571_v62 = vmul.f32 %v2328_v55, %v2328_v55  ;;  %v1801_v41 = vpack.c.bf16 %v926_v38, %v923_v36  ;;  %v954_v46 = vld [vmem:[%s2836_s7 + $0x188] sm:$0xff]  ;;  %v957_v58 = vld [vmem:[%s2836_s7 + $0x1a0] sm:$0xff]  ;;  %v980_v38 = vld [vmem:[%s2836_s7 + $0x258] sm:$0xff] }
 0x29f   :  { %v572_v61 = vmul.f32 %v2332_v57, %v2332_v57  ;;  %v1819_v60 = vpack.c.bf16 %v957_v58, %v954_v46  ;;  %v977_v36 = vld [vmem:[%s2836_s7 + $0x240] sm:$0xff]  ;;  %v958_v46 = vld [vmem:[%s2836_s7 + $0x1a8] sm:$0xff] }
 0x2a0   :  { %v2341_v63 = vsub.f32 %v200_v45, %v567_v59  ;;  %v929_v45 = vld [vmem:[%s2836_s7 + $0xc0] sm:$0xff]  ;;  %v1817_v59 = vpack.c.bf16 %v950_v37, %v947_v28  ;;  %v955_v37 = vld [vmem:[%s2836_s7 + $0x190] sm:$0xff] }
 0x2a1   :  { %638 = vmatprep.mubr.f32.mxu0 %v572_v61  ;;  %v1805_v25 = vpack.c.bf16 %v932_v11, %v929_v45  ;;  %v953_v61 = vld [vmem:[%s2836_s7 + $0x180] sm:$0xff]  ;;  %v983_v45 = vld [vmem:[%s2836_s7 + $0x270] sm:$0xff]  ;;  %v986_v11 = vld [vmem:[%s2836_s7 + $0x288] sm:$0xff] }
 0x2a2   :  { %v573_v0 = vmul.f32 %v2341_v63, %v2341_v63  ;;  %639 = vmatmul.mubr.f32.vlgmr.msra.gmra.mrb[2].mxu0 %v571_v62  ;;  %v956_v62 = vld [vmem:[%s2836_s7 + $0x198] sm:$0xff]  ;;  %v724_v28 = vld [vmem:[%s2837_s3] sm:$0x1] }
 0x2a3   :  { %1790 = vmatpush1.bf16.msra.mxu0 %v1789_v10  ;;  %v1821_v3 = vpack.c.bf16 %v956_v62, %v953_v61  ;;  %v1825_v10 = vpack.c.bf16 %v962_v6, %v959_v5  ;;  %v907_v61 = vld [vmem:[%s2836_s7 + $0x10] sm:$0xff]  ;;  %v910_v62 = vld [vmem:[%s2836_s7 + $0x28] sm:$0xff]  ;;  %v913_v5 = vld [vmem:[%s2836_s7 + $0x40] sm:$0xff] }
 0x2a4   :  { %1633 = vmatmul.mubr.f32.vlgmr.msra.gmra.mrb[10].mxu1 %v573_v0  ;;  %1792 = vmatprep.subr.bf16.mxu0 %v1791_v12  ;;  %v960_v0 = vld [vmem:[%s2836_s7 + $0x1b8] sm:$0xff]  ;;  %v1827_v12 = vpack.c.bf16 %v969_v9, %v966_v8  ;;  %v967_v8 = vld [vmem:[%s2836_s7 + $0x1f0] sm:$0xff] }
 0x2a5   :  { %1389 = vmatpush1.msk.msra.mxu1 %vm405_vm2, %v398_v16  ;;  %793 = vmatprep.mubr.f32.mxu1 %v1949_v2  ;;  %v936_v16 = vld [vmem:[%s2836_s7 + $0xf8] sm:$0xff]  ;;  %v1823_v4 = vpack.c.bf16 %v963_v1, %v960_v0  ;;  %v961_v0 = vld [vmem:[%s2836_s7 + $0x1c0] sm:$0xff] }
 0x2a6   :  { %1635 = vmatprep.subr.mxu1 %v1949_v2  ;;  %v1807_v33 = vpack.c.bf16 %v939_v24, %v936_v16  ;;  %v1841_v16 = vpack.c.bf16 %v986_v11, %v983_v45  ;;  %v964_v1 = vld [vmem:[%s2836_s7 + $0x1d8] sm:$0xff] }
 0x2a7   :  { %1794 = vmatpush1.bf16.msra.mxu0 %v1793_v19  ;;  %v1829_v19 = vpack.c.bf16 %v968_v14, %v965_v13  ;;  %v916_v6 = vld [vmem:[%s2836_s7 + $0x58] sm:$0xff]  ;;  %v922_v13 = vld [vmem:[%s2836_s7 + $0x88] sm:$0xff]  ;;  %v973_v14 = vld [vmem:[%s2836_s7 + $0x220] sm:$0xff] }
 0x2a8   :  { %1796 = vmatprep.subr.bf16.mxu0 %v1795_v23  ;;  %v1831_v23 = vpack.c.bf16 %v975_v18, %v972_v17  ;;  %v1889_v9 = vpack.c.bf16 %v916_v6, %v913_v5  ;;  %v976_v17 = vld [vmem:[%s2836_s7 + $0x238] sm:$0xff] }
 0x2a9   :  { %v940_v45 = vld [vmem:[%s2836_s7 + $0x118] sm:$0xff] }
 0x2ab   :  { %1798 = vmatpush1.bf16.msra.mxu0 %v1797_v32  ;;  %v1833_v32 = vpack.c.bf16 %v974_v7, %v971_v27  ;;  %v928_v27 = vld [vmem:[%s2836_s7 + $0xb8] sm:$0xff]  ;;  %v979_v7 = vld [vmem:[%s2836_s7 + $0x250] sm:$0xff] }
 0x2ac   :  { %1800 = vmatprep.subr.bf16.mxu0 %v1799_v35  ;;  %v1835_v35 = vpack.c.bf16 %v981_v31, %v978_v30  ;;  %v982_v30 = vld [vmem:[%s2836_s7 + $0x268] sm:$0xff] }
 0x2af   :  { %1802 = vmatpush1.bf16.msra.mxu0 %v1801_v41  ;;  %v1837_v41 = vpack.c.bf16 %v980_v38, %v977_v36  ;;  %v934_v36 = vld [vmem:[%s2836_s7 + $0xe8] sm:$0xff]  ;;  %v985_v38 = vld [vmem:[%s2836_s7 + $0x280] sm:$0xff] }
 0x2b0   :  { %1804 = vmatprep.subr.bf16.mxu0 %v1803_v44  ;;  %v1839_v44 = vpack.c.bf16 %v987_v40, %v984_v39  ;;  %v988_v39 = vld [vmem:[%s2836_s7 + $0x298] sm:$0xff] }
 0x2b3   :  { %1806 = vmatpush1.bf16.msra.mxu0 %v1805_v25 }
 0x2b4   :  { %1808 = vmatprep.subr.bf16.mxu0 %v1807_v33 }
 0x2b7   :  { %1810 = vmatpush1.bf16.msra.mxu0 %v1809_v48 }
 0x2b8   :  { %1812 = vmatprep.subr.bf16.mxu0 %v1811_v49 }
 0x2bb   :  { %1814 = vmatpush1.bf16.msra.mxu0 %v1813_v54 }
 0x2bc   :  { %1816 = vmatprep.subr.bf16.mxu0 %v1815_v15 }
 0x2bf   :  { %1818 = vmatpush1.bf16.msra.mxu0 %v1817_v59 }
 0x2c0   :  { %1820 = vmatprep.subr.bf16.mxu0 %v1819_v60  ;;  %v1883_v60 = vpack.c.bf16 %v958_v46, %v955_v37  ;;  %v995_v37 = vld [vmem:[%s2836_s7 + $0x2d0] sm:$0xff] }
 0x2c3   :  { %1822 = vmatpush1.bf16.msra.mxu0 %v1821_v3  ;;  %v1885_v3 = vpack.c.bf16 %v910_v62, %v907_v61 }
 0x2c4   :  { %1824 = vmatprep.subr.bf16.mxu0 %v1823_v4  ;;  %v1887_v4 = vpack.c.bf16 %v964_v1, %v961_v0  ;;  %v1002_v0 = vld [vmem:[%s2836_s7 + $0x308] sm:$0xff]  ;;  %v1005_v1 = vld [vmem:[%s2836_s7 + $0x320] sm:$0xff] }
 0x2c7   :  { %1826 = vmatpush1.bf16.msra.mxu0 %v1825_v10 }
 0x2c8   :  { %1828 = vmatprep.subr.bf16.mxu0 %v1827_v12  ;;  %v919_v12 = vld [vmem:[%s2836_s7 + $0x70] sm:$0xff] }
 0x2c9   :  { %v1893_v18 = vpack.c.bf16 %v922_v13, %v919_v12 }
 0x2cb   :  { %1830 = vmatpush1.bf16.msra.mxu0 %v1829_v19  ;;  %v1895_v19 = vpack.c.bf16 %v976_v17, %v973_v14  ;;  %v1004_v14 = vld [vmem:[%s2836_s7 + $0x318] sm:$0xff]  ;;  %v1003_v17 = vld [vmem:[%s2836_s7 + $0x310] sm:$0xff] }
 0x2cc   :  { %1832 = vmatprep.subr.bf16.mxu0 %v1831_v23  ;;  %v925_v23 = vld [vmem:[%s2836_s7 + $0xa0] sm:$0xff] }
 0x2cd   :  { %v1897_v31 = vpack.c.bf16 %v928_v27, %v925_v23  ;;  %v1011_v27 = vld [vmem:[%s2836_s7 + $0x350] sm:$0xff] }
 0x2cf   :  { %1834 = vmatpush1.bf16.msra.mxu0 %v1833_v32  ;;  %v1899_v32 = vpack.c.bf16 %v982_v30, %v979_v7 }
 0x2d0   :  { %1836 = vmatprep.subr.bf16.mxu0 %v1835_v35  ;;  %v931_v35 = vld [vmem:[%s2836_s7 + $0xd0] sm:$0xff] }
 0x2d1   :  { %v1901_v40 = vpack.c.bf16 %v934_v36, %v931_v35  ;;  %v1007_v35 = vld [vmem:[%s2836_s7 + $0x330] sm:$0xff] }
 0x2d3   :  { %1838 = vmatpush1.bf16.msra.mxu0 %v1837_v41  ;;  %v1903_v41 = vpack.c.bf16 %v988_v39, %v985_v38  ;;  %v1010_v38 = vld [vmem:[%s2836_s7 + $0x348] sm:$0xff]  ;;  %v1009_v39 = vld [vmem:[%s2836_s7 + $0x340] sm:$0xff] }
 0x2d4   :  { %1840 = vmatprep.subr.bf16.mxu0 %v1839_v44  ;;  %v937_v44 = vld [vmem:[%s2836_s7 + $0x100] sm:$0xff] }
 0x2d5   :  { %v1905_v11 = vpack.c.bf16 %v940_v45, %v937_v44  ;;  %v1017_v44 = vld [vmem:[%s2836_s7 + $0x380] sm:$0xff]  ;;  %v1857_v45 = vpack.c.bf16 %v1010_v38, %v1007_v35 }
 0x2d6   :  { %v1045_v38 = vld [vmem:[%s2836_s7 + $0x460] sm:$0xff] }
 0x2d7   :  { %1842 = vmatpush1.bf16.msra.mxu0 %v1841_v16  ;;  %v990_v16 = vld [vmem:[%s2836_s7 + $0x2a8] sm:$0xff] }
 0x375   :  { %v1481_v24 = vpop.f32.mrb[2].mxu0 }
 0x376   :  { %v1482_v25 = vpop.f32.mrb[3].mxu0 }
 0x377   :  { %v1483_v33 = vadd.f32 %v1482_v25, %v1481_v24  ;;  %v710_v34 = vpop.f32.mrb[10].mxu1  ;;  %v993_v24 = vld [vmem:[%s2836_s7 + $0x2c0] sm:$0xff]  ;;  %v991_v25 = vld [vmem:[%s2836_s7 + $0x2b0] sm:$0xff] }
 0x378   :  { %v1634_v42 = vpop.f32.mrb[11].mxu1 }
 0x379   :  { %v711_v43 = vadd.f32 %v1483_v33, %v710_v34  ;;  %v1843_v33 = vpack.c.bf16 %v993_v24, %v990_v16  ;;  %v994_v34 = vld [vmem:[%s2836_s7 + $0x2c8] sm:$0xff]  ;;  %v989_v42 = vld [vmem:[%s2836_s7 + $0x2a0] sm:$0xff] }
 0x37a   :  { %v1013_v16 = vld [vmem:[%s2836_s7 + $0x360] sm:$0xff] }
 0x37b   :  { %v714_v47 = vsel %vm389_vm3, %v711_v43, 0.0  ;;  %v992_v43 = vld [vmem:[%s2836_s7 + $0x2b8] sm:$0xff]  ;;  %1844 = vmatprep.subr.bf16.mxu0 %v1843_v33  ;;  %v1015_v33 = vld [vmem:[%s2836_s7 + $0x370] sm:$0xff] }
 0x37c   :  { %v715_v48 = vrot.slane %v714_v47, 4 }
 0x37e   :  { %v716_v49 = vadd.f32 %v715_v48, %v714_v47  ;;  %v1907_v47 = vpack.c.bf16 %v994_v34, %v991_v25  ;;  %v1845_v48 = vpack.c.bf16 %v992_v43, %v989_v42  ;;  %v1016_v25 = vld [vmem:[%s2836_s7 + $0x378] sm:$0xff]  ;;  %v1018_v34 = vld [vmem:[%s2836_s7 + $0x388] sm:$0xff]  ;;  %v1023_v43 = vld [vmem:[%s2836_s7 + $0x3b0] sm:$0xff] }
 0x37f   :  { %v1020_v42 = vld [vmem:[%s2836_s7 + $0x398] sm:$0xff] }
 0x380   :  { %v717_v50 = vrot.slane %v716_v49, 2  ;;  %1846 = vmatpush1.bf16.msra.mxu0 %v1845_v48  ;;  %v1922_v48 = vpack.c.bf16 %v1018_v34, %v1015_v33  ;;  %v1952_v33 = vmov 1983009808  }
 0x381   :  { %v1356_v34 = vunpack.c.l.s4 %v1952_v33 }
 0x382   :  { %v718_v51 = vadd.f32 %v717_v50, %v716_v49  ;;  %v943_v49 = vld [vmem:[%s2836_s7 + $0x130] sm:$0xff]  ;;  %v946_v50 = vld [vmem:[%s2836_s7 + $0x148] sm:$0xff] }
 0x384   :  { %v719_v52 = vrot.slane %v718_v51, 1 }
 0x386   :  { %v720_v53 = vadd.f32 %v719_v52, %v718_v51  ;;  %v1909_v51 = vpack.c.bf16 %v946_v50, %v943_v49  ;;  %v996_v52 = vld [vmem:[%s2836_s7 + $0x2d8] sm:$0xff]  ;;  %v1019_v49 = vld [vmem:[%s2836_s7 + $0x390] sm:$0xff]  ;;  %v1863_v50 = vpack.c.bf16 %v1023_v43, %v1020_v42 }
 0x388   :  { %v721_v54 = vmul.f32 0.0078125, %v720_v53  ;;  %v999_v53 = vld [vmem:[%s2836_s7 + $0x2f0] sm:$0xff] }
 0x38a   :  { %v722_v15 = vadd.f32 1e-05, %v721_v54  ;;  %v997_v54 = vld [vmem:[%s2836_s7 + $0x2e0] sm:$0xff] }
 0x38c   :  { %1947 = vrsqrt.f32 %v722_v15  ;;  %v1847_v15 = vpack.c.bf16 %v999_v53, %v996_v52  ;;  %v1024_v52 = vld [vmem:[%s2836_s7 + $0x3b8] sm:$0xff]  ;;  %v1026_v53 = vld [vmem:[%s2836_s7 + $0x3c8] sm:$0xff] }
 0x38e   :  { %1848 = vmatprep.subr.bf16.mxu0 %v1847_v15 }
 0x396   :  { %v1948_v58 = vpop.eup %1947 }
 0x397   :  { %v725_v59 = vmul.f32 %v1948_v58, %v724_v28  ;;  %v1000_v28 = vld [vmem:[%s2836_s7 + $0x2f8] sm:$0xff]  ;;  %v998_v58 = vld [vmem:[%s2836_s7 + $0x2e8] sm:$0xff] }
 0x398   :  { %v1911_v46 = vpack.c.bf16 %v1000_v28, %v997_v54  ;;  %v1849_v61 = vpack.c.bf16 %v998_v58, %v995_v37  ;;  %v1029_v54 = vld [vmem:[%s2836_s7 + $0x3e0] sm:$0xff]  ;;  %v1028_v58 = vld [vmem:[%s2836_s7 + $0x3d8] sm:$0xff] }
 0x399   :  { %1390 = vmatmul.mubr.msk.f32.vlgmr.msra.gmra.mrb[12].mxu1 %vm401_vm4, %v725_v59  ;;  %v1025_v37 = vld [vmem:[%s2836_s7 + $0x3c0] sm:$0xff] }
 0x39a   :  { %1636 = vmatpush3.msk.msra.mxu1 %vm405_vm2, %v2297_v56  ;;  %1637 = vmatprep.mubr.msk.f32.mxu1 %vm1950_vm1, %v1949_v2  ;;  %v970_v56 = vld [vmem:[%s2836_s7 + $0x208] sm:$0xff] }
 0x39b   :  { %1884 = vmatprep.subr.bf16.mxu1 %v1883_v60  ;;  %v1891_v10 = vpack.c.bf16 %v970_v56, %v967_v8  ;;  %v952_v60 = vld [vmem:[%s2836_s7 + $0x178] sm:$0xff]  ;;  %1850 = vmatpush1.bf16.msra.mxu0 %v1849_v61 }
 0x39c   :  { %v1032_v61 = vld [vmem:[%s2836_s7 + $0x3f8] sm:$0xff] }
 0x39d   :  { %1638 = vmatmul.mubr.msk.f32.vlgmr.msra.gmra.mrb[14].mxu1 %vm401_vm4, %v725_v59  ;;  %v949_v59 = vld [vmem:[%s2836_s7 + $0x160] sm:$0xff] }
 0x39e   :  { %1886 = vmatpush3.bf16.msra.mxu1 %v1885_v3  ;;  %v1913_v62 = vpack.c.bf16 %v952_v60, %v949_v59  ;;  %v1851_v3 = vpack.c.bf16 %v1005_v1, %v1002_v0  ;;  %v1027_v59 = vld [vmem:[%s2836_s7 + $0x3d0] sm:$0xff]  ;;  %v1030_v60 = vld [vmem:[%s2836_s7 + $0x3e8] sm:$0xff]  ;;  %v1869_v0 = vpack.c.bf16 %v1028_v58, %v1025_v37 }
 0x39f   :  { %1888 = vmatprep.subr.bf16.mxu1 %v1887_v4  ;;  %v2656_v4 = vld [vmem:[%s2838_s4] sm:$0x7]  ;;  %v1928_v1 = vpack.c.bf16 %v1030_v60, %v1027_v59 }
 0x3a0   :  { %1852 = vmatprep.subr.bf16.mxu0 %v1851_v3  ;;  %v890_v13 = vrot.slane %v2656_v4, %v2242_v22  ;;  %v1031_v3 = vld [vmem:[%s2836_s7 + $0x3f0] sm:$0xff] }
 0x3a2   :  { %1890 = vmatpush3.bf16.msra.mxu1 %v1889_v9  ;;  %v894_v9 = vrot.slane %v2656_v4, %v2248_v26 }
 0x3a3   :  { %1892 = vmatprep.subr.bf16.mxu1 %v1891_v10  ;;  %v1001_v10 = vld [vmem:[%s2836_s7 + $0x300] sm:$0xff] }
 0x3a6   :  { %1894 = vmatpush3.bf16.msra.mxu1 %v1893_v18  ;;  %v1006_v18 = vld [vmem:[%s2836_s7 + $0x328] sm:$0xff] }
 0x3a7   :  { %1896 = vmatprep.subr.bf16.mxu1 %v1895_v19 }
 0x3aa   :  { %1898 = vmatpush3.bf16.msra.mxu1 %v1897_v31  ;;  %v1853_v31 = vpack.c.bf16 %v1004_v14, %v1001_v10  ;;  %v1041_v10 = vld [vmem:[%s2836_s7 + $0x440] sm:$0xff] }
 0x3ab   :  { %1900 = vmatprep.subr.bf16.mxu1 %v1899_v32  ;;  %v1916_v32 = vpack.c.bf16 %v1006_v18, %v1003_v17  ;;  %v1037_v14 = vld [vmem:[%s2836_s7 + $0x420] sm:$0xff]  ;;  %v1040_v18 = vld [vmem:[%s2836_s7 + $0x438] sm:$0xff] }
 0x3ae   :  { %1902 = vmatpush3.bf16.msra.mxu1 %v1901_v40  ;;  %v1012_v40 = vld [vmem:[%s2836_s7 + $0x358] sm:$0xff] }
 0x3af   :  { %1904 = vmatprep.subr.bf16.mxu1 %v1903_v41  ;;  %v1014_v41 = vld [vmem:[%s2836_s7 + $0x368] sm:$0xff] }
 0x3b0   :  { %v1859_v24 = vpack.c.bf16 %v1017_v44, %v1014_v41  ;;  %v898_v44 = vrot.slane %v2656_v4, %v2252_v29 }
 0x3b2   :  { %1906 = vmatpush3.bf16.msra.mxu1 %v1905_v11  ;;  %v1919_v11 = vpack.c.bf16 %v1012_v40, %v1009_v39  ;;  %v1048_v39 = vld [vmem:[%s2836_s7 + $0x478] sm:$0xff] }
 0x3b3   :  { %1908 = vmatprep.subr.bf16.mxu1 %v1907_v47  ;;  %v1861_v47 = vpack.c.bf16 %v1016_v25, %v1013_v16  ;;  %v1049_v25 = vld [vmem:[%s2839_s8] sm:$0x7] }
 0x3b4   :  { %v1054_v4 = vrot.slane %v1049_v25, %v2242_v22 }
 0x3b6   :  { %1910 = vmatpush3.bf16.msra.mxu1 %v1909_v51  ;;  %v1022_v51 = vld [vmem:[%s2836_s7 + $0x3a8] sm:$0xff] }
 0x3b7   :  { %1912 = vmatprep.subr.bf16.mxu1 %v1911_v46  ;;  %v1865_v15 = vpack.c.bf16 %v1022_v51, %v1019_v49  ;;  %v1867_v46 = vpack.c.bf16 %v1029_v54, %v1026_v53 }
 0x3ba   :  { %1914 = vmatpush3.bf16.msra.mxu1 %v1913_v62  ;;  %v1035_v62 = vld [vmem:[%s2836_s7 + $0x410] sm:$0xff] }
 0x3bb   :  { %1915 = vmatprep.subr.bf16.mxu1 %v1951_v20 }
 0x46c   :  { %v795_v5 = vpop.f32.mrb[12].mxu1 }
 0x46d   :  { %v873_v6 = vrot.slane %v795_v5, %v2242_v22  ;;  %v797_v8 = vpop.f32.mrb[13].mxu1  ;;  %v1871_v5 = vpack.c.bf16 %v1035_v62, %v1032_v61 }
 0x46e   :  { %v877_v56 = vrot.slane %v797_v8, %v2242_v22  ;;  %v1033_v8 = vld [vmem:[%s2836_s7 + $0x400] sm:$0xff] }
 0x46f   :  { %v882_v12 = vmul.f32 %v873_v6, %v2328_v55  ;;  %v1008_v55 = vld [vmem:[%s2836_s7 + $0x338] sm:$0xff]  ;;  %v1034_v6 = vld [vmem:[%s2836_s7 + $0x408] sm:$0xff] }
 0x470   :  { %v883_v19 = vmul.f32 %v877_v56, %v2332_v57  ;;  %v2678_v23 = vpop.f32.mrb[14].mxu1  ;;  %v1855_v57 = vpack.c.bf16 %v1011_v27, %v1008_v55  ;;  %v1036_v56 = vld [vmem:[%s2836_s7 + $0x418] sm:$0xff]  ;;  %v1042_v55 = vld [vmem:[%s2836_s7 + $0x448] sm:$0xff] }
 0x471   :  { %v1639_v7 = vpop.f32.mrb[15].mxu1  ;;  %v902_v36 = vadd.f32 %v890_v13, %v882_v12  ;;  %v1873_v12 = vpack.c.bf16 %v1034_v6, %v1031_v3  ;;  %v1931_v13 = vpack.c.bf16 %v1036_v56, %v1033_v8  ;;  %v1044_v27 = vld [vmem:[%s2836_s7 + $0x458] sm:$0xff]  ;;  %v881_v35 = vrot.slane %v2678_v23, %v2242_v22 }
 0x472   :  { %v903_v30 = vadd.f32 %v894_v9, %v883_v19  ;;  %v1038_v9 = vld [vmem:[%s2836_s7 + $0x428] sm:$0xff]  ;;  %v1039_v19 = vld [vmem:[%s2836_s7 + $0x430] sm:$0xff]  ;;  %v1937_v23 = vpack.c.bf16 %v1048_v39, %v1045_v38 }
 0x473   :  { %v1875_v17 = vpack.c.bf16 %v1041_v10, %v1038_v9  ;;  %v1047_v7 = vld [vmem:[%s2836_s7 + $0x470] sm:$0xff]  ;;  %v884_v41 = vmul.f32 %v881_v35, %v2341_v63  ;;  %v1062_v63 = vrot.slane %v1049_v25, %v2252_v29 }
 0x474   :  { %1130 = vmatprep.mubr.f32.mxu0 %v903_v30  ;;  %1272 = vmatprep.mubr.f32.mxu1 %v903_v30  ;;  %v1877_v30 = vpack.c.bf16 %v1040_v18, %v1037_v14 }
 0x475   :  { %1131 = vmatmul.mubr.f32.vlgmr.msra.gmra.mrb[4].mxu0 %v902_v36  ;;  %1273 = vmatmul.mubr.f32.vlgmr.msra.gmra.mrb[16].mxu1 %v902_v36  ;;  %v1879_v36 = vpack.c.bf16 %v1047_v7, %v1044_v27 }
 0x476   :  { %1854 = vmatpush1.bf16.msra.mxu0 %v1853_v31  ;;  %1917 = vmatpush3.bf16.msra.mxu1 %v1916_v32  ;;  %v1934_v31 = vpack.c.bf16 %v1042_v55, %v1039_v19  ;;  %v1043_v32 = vld [vmem:[%s2836_s7 + $0x450] sm:$0xff] }
 0x477   :  { %1856 = vmatprep.subr.bf16.mxu0 %v1855_v57  ;;  %1918 = vmatprep.subr.bf16.mxu1 %v1951_v20  ;;  %v1046_v57 = vld [vmem:[%s2836_s7 + $0x468] sm:$0xff] }
 0x478   :  { %1201 = vmatprep.mubr.f32.mxu0 %v1949_v2  ;;  %1672 = vmatprep.mubr.msk.f32.mxu1 %vm1950_vm1, %v1949_v2  ;;  %v1021_v2 = vld [vmem:[%s2836_s7 + $0x3a0] sm:$0xff]  ;;  %v1881_v40 = vpack.c.bf16 %v1046_v57, %v1043_v32 }
 0x479   :  { %v1925_v28 = vpack.c.bf16 %v1024_v52, %v1021_v2 }
 0x47a   :  { %1858 = vmatpush1.bf16.msra.mxu0 %v1857_v45  ;;  %1920 = vmatpush3.bf16.msra.mxu1 %v1919_v11  ;;  %v904_v45 = vadd.f32 %v898_v44, %v884_v41 }
 0x47b   :  { %1860 = vmatprep.subr.bf16.mxu0 %v1859_v24  ;;  %1921 = vmatprep.subr.bf16.mxu1 %v1951_v20 }
 0x47e   :  { %1862 = vmatpush1.bf16.msra.mxu0 %v1861_v47  ;;  %1923 = vmatpush3.bf16.msra.mxu1 %v1922_v48  ;;  %v1357_v48 = vunpack.c.0.s8 %v1356_v34 }
 0x47f   :  { %1864 = vmatprep.subr.bf16.mxu0 %v1863_v50  ;;  %1924 = vmatprep.subr.bf16.mxu1 %v1951_v20 }
 0x480   :  { %v1360_v29 = vsub.s32 %v1357_v48, %v2239_v21 }
 0x482   :  { %1866 = vmatpush1.bf16.msra.mxu0 %v1865_v15  ;;  %1926 = vmatpush3.bf16.msra.mxu1 %v1925_v28 }
 0x483   :  { %1868 = vmatprep.subr.bf16.mxu0 %v1867_v46  ;;  %1927 = vmatprep.subr.bf16.mxu1 %v1951_v20 }
 0x486   :  { %1870 = vmatpush1.bf16.msra.mxu0 %v1869_v0  ;;  %1929 = vmatpush3.bf16.msra.mxu1 %v1928_v1 }
 0x487   :  { %1872 = vmatprep.subr.bf16.mxu0 %v1871_v5  ;;  %1930 = vmatprep.subr.bf16.mxu1 %v1951_v20 }
 0x48a   :  { %1874 = vmatpush1.bf16.msra.mxu0 %v1873_v12  ;;  %1932 = vmatpush3.bf16.msra.mxu1 %v1931_v13 }
 0x48b   :  { %1876 = vmatprep.subr.bf16.mxu0 %v1875_v17  ;;  %1933 = vmatprep.subr.bf16.mxu1 %v1951_v20 }
 0x48e   :  { %1878 = vmatpush1.bf16.msra.mxu0 %v1877_v30  ;;  %1935 = vmatpush3.bf16.msra.mxu1 %v1934_v31 }
 0x48f   :  { %1880 = vmatprep.subr.bf16.mxu0 %v1879_v36  ;;  %1936 = vmatprep.subr.bf16.mxu1 %v1951_v20  ;;  %v1058_v20 = vrot.slane %v1049_v25, %v2248_v26 }
 0x492   :  { %1882 = vmatpush1.bf16.msra.mxu0 %v1881_v40  ;;  %1938 = vmatpush3.bf16.msra.mxu1 %v1937_v23 }
 0x495   :  { %1202 = vmatmul.mubr.f32.vlgmr.msra.gmra.mrb[4].mxu0 %v904_v45  ;;  %1673 = vmatmul.mubr.f32.vlgmr.msra.gmra.mrb[18].mxu1 %v904_v45 }
 0x548   :  { %v1535_v11 = vpop.f32.mrb[16].mxu1 }
 0x549   :  { %v1536_v16 = vpop.f32.mrb[17].mxu1 }
 0x54a   :  { %v1537_v24 = vadd.f32 %v1536_v16, %v1535_v11 }
 0x54c   :  { %v1275_v42 = vadd.f32 %v1537_v24, %v1062_v63 }
 0x568   :  { %v1203_v43 = vpop.f32.mrb[4].mxu0  ;;  %v1344_v47 = vpop.f32.mrb[18].mxu1 }
 0x569   :  { %v1939_v49 = vadd.f32 %v1203_v43, %v1054_v4  ;;  %v1345_v50 = vadd.f32 %v1344_v47, %v1275_v42  ;;  %v1205_v51 = vpop.f32.mrb[5].mxu0  ;;  %v1674_v2 = vpop.f32.mrb[19].mxu1 }
 0x56a   :  { %v1940_v52 = vadd.f32 %v1205_v51, %v1058_v20 }
 0x56b   :  { %v1348_v53 = vmax.f32 %v1939_v49, 0.0  ;;  %v1350_v54 = vmax.f32 %v1345_v50, 0.0 }
 0x56c   :  { %v1349_v15 = vmax.f32 %v1940_v52, 0.0 }
 0x56d   :  { %v1368_v22 = vrot.slane %v1350_v54, %v1360_v29 }
 0x56e   :  { %v1354_v28 = vcombine.low %v1348_v53, %v1349_v15 }
 0x570   :  { %v1361_v26 = vrot.slane %v1354_v28, %v1360_v29 }
 0x572   :  { %v1369_v37 = vcombine.low %v1361_v26, %v1368_v22 }
 0x574   :  { %1376 = vst.msk [vmem:[%s2840_s9] sm:$0x3f] %vm1375_vm9, %v1369_v37 }

</bundles_post_ra>
